<compile_context>
chip_gen: v7x
topology: tpu7x:2x2x1
jax: 0.10.0
libtpu: 0.0.40
codegen_flags: <defaults>
</compile_context>

<pallas_src>
import math

import jax
import jax.numpy as jnp
from jax.experimental import pallas as pl
from jax.experimental.pallas import tpu as pltpu


def _round_up(x, m):
    return (x + m - 1) // m * m


# ---------------------------------------------------------------------------
# Kernel
# ---------------------------------------------------------------------------
def _box_offset_intersection_kernel(emb_ref, w1_ref, b1_ref, w2_ref, b2_ref,
                                    out_ref):
    """emb_ref: [N, tile_b, Dp] f32; w*: [Dp, Dp] bf16; b*: [1, Dp] f32;
    out_ref: [tile_b, Dp]."""
    n_sets, tile_b, dp = emb_ref.shape

    emb = emb_ref[...]                                     # (N, tb, Dp) f32

    # --- layer 1: ONE tall matmul over all sets (MXU in bf16, f32 acc) ------
    # Leading-dim collapse (N, tb, Dp) -> (N*tb, Dp) is tile-boundary safe
    # (tb is a multiple of 8, Dp a multiple of 128), so the reshape is free.
    x_all = emb.reshape(n_sets * tile_b, dp).astype(jnp.bfloat16)
    h = jnp.dot(x_all, w1_ref[...], preferred_element_type=jnp.float32)
    h = jnp.maximum(h + b1_ref[...], 0.0)                  # bias + ReLU once

    # mean over the set axis (f32, VPU adds over N slices)
    layer1_mean = h.reshape(n_sets, tile_b, dp).sum(axis=0) * (1.0 / n_sets)

    # --- layer 2 + sigmoid gate ---------------------------------------------
    z = jnp.dot(layer1_mean.astype(jnp.bfloat16), w2_ref[...],
                preferred_element_type=jnp.float32) + b2_ref[...]
    # exp and approx reciprocal both run on the EUP slot (free next to MXU/VPU).
    gate = pl.reciprocal(1.0 + jnp.exp(-z), approx=True)

    # --- min over the set axis, gated output --------------------------------
    off_min = emb.min(axis=0)                              # exact f32 min
    out_ref[...] = (off_min * gate).astype(out_ref.dtype)


# ---------------------------------------------------------------------------
# Parameter prep (pad + cast ONCE, not per forward call)
# ---------------------------------------------------------------------------
def prepare_box_offset_params(w1, b1, w2, b2, *, weight_dtype=jnp.bfloat16):
    """w1, w2: [dim, dim] stored as [in, out] (x @ W == PyTorch x @ W.T);
    b1, b2: [1, dim].  Returns lane-padded (multiple-of-128) params with the
    weights cast to `weight_dtype`, plus the original dim."""
    dim = w1.shape[0]
    dp = _round_up(dim, 128)
    pad = dp - dim
    if pad:
        # Zero-padded K rows / N cols contribute exactly zero; padded output
        # lanes are sliced off after the kernel.
        w1 = jnp.pad(w1, ((0, pad), (0, pad)))
        w2 = jnp.pad(w2, ((0, pad), (0, pad)))
        b1 = jnp.pad(b1, ((0, 0), (0, pad)))
        b2 = jnp.pad(b2, ((0, 0), (0, pad)))
    return (w1.astype(weight_dtype), b1.astype(jnp.float32),
            w2.astype(weight_dtype), b2.astype(jnp.float32), dim)


# ---------------------------------------------------------------------------
# Forward wrapper
# ---------------------------------------------------------------------------
def box_offset_intersection(embeddings, params, *, tile_b=256, out_dtype=None):
    """embeddings: [num_sets, batch, dim] (or [num_sets, dim]).
    params: output of prepare_box_offset_params."""
    w1p, b1p, w2p, b2p, dim = params
    dp = w1p.shape[0]

    squeeze_batch = embeddings.ndim == 2
    if squeeze_batch:
        embeddings = embeddings[:, None, :]
    n_sets, batch, d = embeddings.shape
    assert d == dim, (d, dim)
    if out_dtype is None:
        out_dtype = embeddings.dtype

    # --- tile sizing ---------------------------------------------------------
    tile_b = max(8, min(_round_up(tile_b, 8), _round_up(batch, 8)))
    if batch >= 16:
        # Guarantee >= 2 grid steps so v7x megacore ("parallel") can shard the
        # batch across both TensorCores.
        half = _round_up((batch + 1) // 2, 8)
        tile_b = min(tile_b, half)
    bp = _round_up(batch, tile_b)

    # --- activation padding (weights are already padded at prep time) -------
    if dp != d or bp != batch:
        embeddings = jnp.pad(
            embeddings, ((0, 0), (0, bp - batch), (0, dp - d)))
    # TODO(synk): for steady-state serving, pre-pad embeddings upstream so this
    # per-call pad (an extra HBM pass over the activations) disappears too.

    grid = (bp // tile_b,)

    # --- VMEM budget (bytes): double-buffered activations/output, single-
    # buffered bf16 weights, headroom for f32 intermediates inside the kernel.
    vmem_bytes = (2 * n_sets * tile_b * dp * 4      # embeddings (x2 buffers)
                  + 2 * tile_b * dp * 4             # output      (x2 buffers)
                  + 2 * dp * dp * 2                 # w1 + w2, bf16, 1 buffer
                  + 4 * dp * 4                      # biases
                  + 3 * n_sets * tile_b * dp * 4)   # f32 intermediates headroom
    vmem_bytes = int(min(max(vmem_bytes, 8 * 1024 * 1024), 100 * 1024 * 1024))

    const_idx = lambda i: (0, 0)
    out = pl.pallas_call(
        _box_offset_intersection_kernel,
        out_shape=jax.ShapeDtypeStruct((bp, dp), out_dtype),
        grid_spec=pltpu.PrefetchScalarGridSpec(
            num_scalar_prefetch=0,
            grid=grid,
            in_specs=[
                # Batch-tiled embeddings; all sets resident per grid step.
                pl.BlockSpec((n_sets, tile_b, dp), lambda i: (0, i, 0)),
                # Weights / biases: whole blocks, constant index across the
                # grid -> single-buffered (no wasted second VMEM buffer).
                pl.BlockSpec((dp, dp), const_idx, pipeline_mode=pl.Buffered(1)),
                pl.BlockSpec((1, dp), const_idx, pipeline_mode=pl.Buffered(1)),
                pl.BlockSpec((dp, dp), const_idx, pipeline_mode=pl.Buffered(1)),
                pl.BlockSpec((1, dp), const_idx, pipeline_mode=pl.Buffered(1)),
            ],
            out_specs=pl.BlockSpec((tile_b, dp), lambda i: (i, 0)),
        ),
        compiler_params=pltpu.CompilerParams(
            dimension_semantics=("parallel",),
            vmem_limit_bytes=vmem_bytes),
    )(embeddings, w1p, b1p, w2p, b2p)

    out = out[:batch, :d]
    return out[0] if squeeze_batch else out


# ---------------------------------------------------------------------------
# Init matching the PyTorch module
# ---------------------------------------------------------------------------
def init_box_offset_intersection_params(key, dim):
    """xavier_uniform_ on weights, nn.Linear default uniform biases.
    Weights returned transposed as [in, out]."""
    k1, k2, k3, k4 = jax.random.split(key, 4)
    limit = math.sqrt(6.0 / (dim + dim))
    bound = 1.0 / math.sqrt(dim)
    w1 = jax.random.uniform(k1, (dim, dim), jnp.float32, -limit, limit)
    b1 = jax.random.uniform(k2, (1, dim), jnp.float32, -bound, bound)
    w2 = jax.random.uniform(k3, (dim, dim), jnp.float32, -limit, limit)
    b2 = jax.random.uniform(k4, (1, dim), jnp.float32, -bound, bound)
    return w1, b1, w2, b2


if __name__ == "__main__":
    # Small shapes consistent with the module: a 3-way intersection of
    # batch=8 box-offset embeddings of dim=32.
    num_sets = 3
    batch = 8
    dim = 32

    key = jax.random.PRNGKey(0)
    k_x, k_p = jax.random.split(key)
    embeddings = jax.random.normal(k_x, (num_sets, batch, dim), jnp.float32)
    w1, b1, w2, b2 = init_box_offset_intersection_params(k_p, dim)

    # Pad + cast the weights ONCE (not inside the per-call forward path).
    params = prepare_box_offset_params(w1, b1, w2, b2)

    out = box_offset_intersection(embeddings, params, tile_b=256)
    out = jax.block_until_ready(out)

    # Pure-JAX f32 reference (identical math to the PyTorch module's forward).
    h = jnp.maximum(jnp.einsum("nbd,de->nbe", embeddings, w1) + b1, 0.0)
    layer1_mean = jnp.mean(h, axis=0)
    gate = 1.0 / (1.0 + jnp.exp(-(layer1_mean @ w2 + b2)))
    offset = jnp.min(embeddings, axis=0)
    ref = offset * gate

    assert out.shape == (batch, dim), out.shape
    max_err = float(jnp.max(jnp.abs(out - ref)))
    # bf16 MXU inputs + approx reciprocal in the gate -> loosened tolerance
    # vs. the f32 reference (still ~1e-3-level in practice at dim=32).
    assert jnp.allclose(out, ref, atol=2e-2, rtol=2e-2), max_err

    print("KERNEL_OK")
</pallas_src>

<mosaic_0001>
module attributes {stable_mosaic.version = 11 : i64} {
  func.func @_box_offset_intersection_kernel(%arg0: i32, %arg1: memref<3x8x128xf32, #tpu.memory_space<vmem>>, %arg2: memref<128x128xbf16, #tpu.memory_space<vmem>>, %arg3: memref<1x128xf32, #tpu.memory_space<vmem>>, %arg4: memref<128x128xbf16, #tpu.memory_space<vmem>>, %arg5: memref<1x128xf32, #tpu.memory_space<vmem>>, %arg6: memref<8x128xf32, #tpu.memory_space<vmem>>) attributes {dimension_semantics = [#tpu.dimension_semantics<parallel>], iteration_bounds = array<i64: 1>, scalar_prefetch = 0 : i64, scratch_operands = 0 : i64, tpu.core_type = #tpu.core_type<tc>, window_params = [{transform_indices = @transform_0, window_bounds = array<i64: 3, 8, 128>}, {pipeline_mode = #tpu.pipeline_mode<synchronous>, transform_indices = @transform_1, window_bounds = array<i64: 128, 128>}, {pipeline_mode = #tpu.pipeline_mode<synchronous>, transform_indices = @transform_2, window_bounds = array<i64: 1, 128>}, {pipeline_mode = #tpu.pipeline_mode<synchronous>, transform_indices = @transform_3, window_bounds = array<i64: 128, 128>}, {pipeline_mode = #tpu.pipeline_mode<synchronous>, transform_indices = @transform_4, window_bounds = array<i64: 1, 128>}, {transform_indices = @transform_5, window_bounds = array<i64: 8, 128>}]} {
    %c0 = arith.constant 0 : index
    %c0_0 = arith.constant 0 : index
    %c0_1 = arith.constant 0 : index
    %0 = vector.load %arg1[%c0, %c0_0, %c0_1] : memref<3x8x128xf32, #tpu.memory_space<vmem>>, vector<3x8x128xf32>
    %1 = vector.shape_cast %0 : vector<3x8x128xf32> to vector<24x128xf32>
    %2 = arith.truncf %1 : vector<24x128xf32> to vector<24x128xbf16>
    %c0_2 = arith.constant 0 : index
    %c0_3 = arith.constant 0 : index
    %3 = vector.load %arg2[%c0_2, %c0_3] : memref<128x128xbf16, #tpu.memory_space<vmem>>, vector<128x128xbf16>
    %cst = arith.constant dense<0.000000e+00> : vector<24x128xf32>
    %4 = tpu.matmul %2, %3, %cst {dimension_numbers = #tpu.dot_dimension_numbers<[1], [0], [0], [1], [0, 0, 1, 1], [], []>} : vector<24x128xbf16>, vector<128x128xbf16>, vector<24x128xf32> -> vector<24x128xf32>
    %c0_4 = arith.constant 0 : index
    %c0_5 = arith.constant 0 : index
    %5 = vector.load %arg3[%c0_4, %c0_5] : memref<1x128xf32, #tpu.memory_space<vmem>>, vector<1x128xf32>
    %6 = vector.broadcast %5 : vector<1x128xf32> to vector<24x128xf32>
    %7 = arith.addf %4, %6 : vector<24x128xf32>
    %cst_6 = arith.constant 0.000000e+00 : f32
    %8 = vector.broadcast %cst_6 : f32 to vector<24x128xf32>
    %9 = arith.maximumf %7, %8 : vector<24x128xf32>
    %10 = vector.shape_cast %9 : vector<24x128xf32> to vector<3x8x128xf32>
    %cst_7 = arith.constant dense<0.000000e+00> : vector<8x128xf32>
    %11 = vector.multi_reduction <add>, %10, %cst_7 [0] : vector<3x8x128xf32> to vector<8x128xf32>
    %cst_8 = arith.constant 0.333333343 : f32
    %12 = vector.broadcast %cst_8 : f32 to vector<8x128xf32>
    %13 = arith.mulf %11, %12 : vector<8x128xf32>
    %14 = arith.truncf %13 : vector<8x128xf32> to vector<8x128xbf16>
    %c0_9 = arith.constant 0 : index
    %c0_10 = arith.constant 0 : index
    %15 = vector.load %arg4[%c0_9, %c0_10] : memref<128x128xbf16, #tpu.memory_space<vmem>>, vector<128x128xbf16>
    %cst_11 = arith.constant dense<0.000000e+00> : vector<8x128xf32>
    %16 = tpu.matmul %14, %15, %cst_11 {dimension_numbers = #tpu.dot_dimension_numbers<[1], [0], [0], [1], [0, 0, 1, 1], [], []>} : vector<8x128xbf16>, vector<128x128xbf16>, vector<8x128xf32> -> vector<8x128xf32>
    %c0_12 = arith.constant 0 : index
    %c0_13 = arith.constant 0 : index
    %17 = vector.load %arg5[%c0_12, %c0_13] : memref<1x128xf32, #tpu.memory_space<vmem>>, vector<1x128xf32>
    %18 = vector.broadcast %17 : vector<1x128xf32> to vector<8x128xf32>
    %19 = arith.addf %16, %18 : vector<8x128xf32>
    %cst_14 = arith.constant 0.000000e+00 : f32
    %20 = vector.broadcast %cst_14 : f32 to vector<8x128xf32>
    %21 = arith.subf %20, %19 : vector<8x128xf32>
    %22 = math.exp %21 : vector<8x128xf32>
    %cst_15 = arith.constant 1.000000e+00 : f32
    %23 = vector.broadcast %cst_15 : f32 to vector<8x128xf32>
    %24 = arith.addf %23, %22 : vector<8x128xf32>
    %25 = tpu.reciprocal %24 {approx = true} : vector<8x128xf32> -> vector<8x128xf32>
    %cst_16 = arith.constant dense<0x7F800000> : vector<8x128xf32>
    %26 = vector.multi_reduction <minimumf>, %0, %cst_16 [0] : vector<3x8x128xf32> to vector<8x128xf32>
    %27 = arith.mulf %26, %25 : vector<8x128xf32>
    %c0_17 = arith.constant 0 : index
    %c0_18 = arith.constant 0 : index
    %28 = vector.load %arg6[%c0_17, %c0_18] : memref<8x128xf32, #tpu.memory_space<vmem>>, vector<8x128xf32>
    tpu.vector_store %arg6[%c0_17, %c0_18], %27 {strides = array<i32>} : memref<8x128xf32, #tpu.memory_space<vmem>>, vector<8x128xf32>,
    return
  }
  func.func @transform_0(%arg0: i32) -> (i32, i32, i32) {
    %c0_i32 = arith.constant 0 : i32
    %c0_i32_0 = arith.constant 0 : i32
    %c0_i32_1 = arith.constant 0 : i32
    return %c0_i32, %arg0, %c0_i32_0 : i32, i32, i32
  }
  func.func @transform_1(%arg0: i32) -> (i32, i32) {
    %c0_i32 = arith.constant 0 : i32
    %c0_i32_0 = arith.constant 0 : i32
    %c0_i32_1 = arith.constant 0 : i32
    return %c0_i32, %c0_i32_0 : i32, i32
  }
  func.func @transform_2(%arg0: i32) -> (i32, i32) {
    %c0_i32 = arith.constant 0 : i32
    %c0_i32_0 = arith.constant 0 : i32
    %c0_i32_1 = arith.constant 0 : i32
    return %c0_i32, %c0_i32_0 : i32, i32
  }
  func.func @transform_3(%arg0: i32) -> (i32, i32) {
    %c0_i32 = arith.constant 0 : i32
    %c0_i32_0 = arith.constant 0 : i32
    %c0_i32_1 = arith.constant 0 : i32
    return %c0_i32, %c0_i32_0 : i32, i32
  }
  func.func @transform_4(%arg0: i32) -> (i32, i32) {
    %c0_i32 = arith.constant 0 : i32
    %c0_i32_0 = arith.constant 0 : i32
    %c0_i32_1 = arith.constant 0 : i32
    return %c0_i32, %c0_i32_0 : i32, i32
  }
  func.func @transform_5(%arg0: i32) -> (i32, i32) {
    %c0_i32 = arith.constant 0 : i32
    %c0_i32_0 = arith.constant 0 : i32
    return %arg0, %c0_i32 : i32, i32
  }
}

</mosaic_0001>

<bundles_post_ra>
// kernel: tpu_custom_call.1
= control target key start
LH: loop header
LB: loop body
LE: loop exit
PB: predicated region body
PF: predicated region fallthrough
CT: control target
= control target key end

     0   :  { %10 = vsyncpa [#allocation3], 0  ;;  %s634_s0 = inlined_call_operand.hbm [shape: f32[3,8,128], index: 0, kind: input, shape index: {}]   ;;  %s635_s1 = inlined_call_operand.hbm [shape: bf16[128,128], index: 1, kind: input, shape index: {}]   ;;  %s636_s2 = inlined_call_operand.vmem [shape: f32[1,128], index: 2, kind: input, shape index: {}]   ;;  %s637_s3 = inlined_call_operand.hbm [shape: bf16[128,128], index: 3, kind: input, shape index: {}]   ;;  %s638_s4 = inlined_call_operand.vmem [shape: f32[1,128], index: 4, kind: input, shape index: {}]   ;;  %s639_s5 = inlined_call_operand.hbm [shape: f32[8,128], index: 5, kind: output, shape index: {}]  }
   0x1   :  { %11 = vsyncpa [#allocation6], 0 }
   0x2   :  { %12 = vsyncpa [#allocation4], 0  ;;  %s531_s18 = smov [#allocation5]   ;;  %s437_s22 = scalar_lea.hbm %s635_s1, 1024 }
   0x3   :  { %s30_s19 = sshll.u32 %s531_s18, 4  ;;  %p438_p0 = scmp.ne.s32.totalorder %s635_s1, %s437_s22  ;;  %s31_s19 = int_to_ptr.vmem [resolvable:$true] %s30_s19 }
   0x4   :  { %p441_p1 = scmp.lt.u32.totalorder %s437_s22, %s635_s1 }
   0x6   :  { %p443_p2 = pnand %p441_p1, %p438_p0 }
   0x8   :  { %446 = shalt.err (!%p443_p2)
}
   0x9   :  { %s447_s27 = scalar_lea.vmem %s31_s19, 1024  ;;  %p452_p4 = scmp.lt.s32.totalorder %s31_s19, %s31_s19 }
   0xa   :  { %p448_p3 = scmp.ne.s32.totalorder %s31_s19, %s447_s27  ;;  %p453_p5 = scmp.lt.s32.totalorder %s447_s27, %s447_s27 }
   0xc   :  { %p454_p6 = por %p453_p5, %p452_p4 }
   0xe   :  { %p455_p7 = pnand %p454_p6, %p448_p3 }
  0x10   :  { %458 = shalt.err (!%p455_p7)
}
  0x11   :  { %s532_s28 = smov 64   ;;  %s533_s29 = smov 4  }
  0x12   :  { %36 = dma.hbm_to_vmem [thread:$0]  %s635_s1, 1024, %s31_s19, [#allocation6], %s532_s28, %s532_s28, %s533_s29  }
  0x13   :  { %s534_s7 = smov [#allocation2]   ;;  %s459_s11 = scalar_lea.hbm %s634_s0, 384 }
  0x14   :  { %s18_s8 = sshll.u32 %s534_s7, 4  ;;  %p460_p8 = scmp.ne.s32.totalorder %s634_s0, %s459_s11  ;;  %s19_s8 = int_to_ptr.vmem [resolvable:$true] %s18_s8 }
  0x15   :  { %p463_p9 = scmp.lt.u32.totalorder %s459_s11, %s634_s0 }
  0x17   :  { %p465_p10 = pnand %p463_p9, %p460_p8 }
  0x19   :  { %468 = shalt.err (!%p465_p10)
}
  0x1a   :  { %s469_s16 = scalar_lea.vmem %s19_s8, 384  ;;  %p474_p12 = scmp.lt.s32.totalorder %s19_s8, %s19_s8 }
  0x1b   :  { %p470_p11 = scmp.ne.s32.totalorder %s19_s8, %s469_s16  ;;  %p475_p13 = scmp.lt.s32.totalorder %s469_s16, %s469_s16 }
  0x1d   :  { %p476_p0 = por %p475_p13, %p474_p12 }
  0x1f   :  { %p477_p1 = pnand %p476_p0, %p470_p11 }
  0x21   :  { %480 = shalt.err (!%p477_p1)
}
  0x22   :  { %s535_s1 = smov 128   ;;  %s536_s17 = smov 8  }
  0x23   :  { %24 = dma.hbm_to_vmem [thread:$0]  %s634_s0, 384, %s19_s8, [#allocation3], %s535_s1, %s535_s1, %s536_s17  }
  0x24   :  { %s537_s20 = smov [#allocation7]   ;;  %s481_s24 = scalar_lea.hbm %s637_s3, 1024 }
  0x25   :  { %s44_s21 = sshll.u32 %s537_s20, 4  ;;  %p482_p2 = scmp.ne.s32.totalorder %s637_s3, %s481_s24  ;;  %s45_s21 = int_to_ptr.vmem [resolvable:$true] %s44_s21 }
  0x26   :  { %p485_p3 = scmp.lt.u32.totalorder %s481_s24, %s637_s3 }
  0x28   :  { %p487_p4 = pnand %p485_p3, %p482_p2 }
  0x2a   :  { %490 = shalt.err (!%p487_p4)
}
  0x2b   :  { %s491_s6 = scalar_lea.vmem %s45_s21, 1024  ;;  %p496_p6 = scmp.lt.s32.totalorder %s45_s21, %s45_s21 }
  0x2c   :  { %p492_p5 = scmp.ne.s32.totalorder %s45_s21, %s491_s6  ;;  %p497_p7 = scmp.lt.s32.totalorder %s491_s6, %s491_s6 }
  0x2e   :  { %p498_p8 = por %p497_p7, %p496_p6 }
  0x30   :  { %p499_p9 = pnand %p498_p8, %p492_p5 }
  0x32   :  { %502 = shalt.err (!%p499_p9)
}
  0x33   :  { %50 = dma.hbm_to_vmem [thread:$0]  %s637_s3, 1024, %s45_s21, [#allocation6], %s532_s28, %s532_s28, %s533_s29  }
  0x34   :  { %525 = dma.done.wait [#allocation3], 384  }
  0x35   :  { %526 = vsyncadd [#allocation3], 4294966912 }
  0x36   :  { %527 = dma.done.wait [#allocation6], 2048  }
  0x37   :  { %528 = vsyncadd [#allocation6], 4294965248  ;;  %v538_v0 = vmov 0.0   ;;  %v417_v1 = vld [vmem:[#allocation5] sm:$0xff]   ;;  %v418_v2 = vld [vmem:[#allocation5 + $0x8] sm:$0xff]   ;;  %vm539_vm0 = vmmov 0  }
  0x38   :  { %387 = vmatprep.subr.bf16.mxu1 %v538_v0  ;;  %367 = vmatprep.subr.bf16.mxu0 %v417_v1  ;;  %v419_v3 = vld [vmem:[#allocation5 + $0x10] sm:$0xff]   ;;  %v420_v4 = vld [vmem:[#allocation5 + $0x18] sm:$0xff]   ;;  %v63_v5 = vld [vmem:[#allocation2] sm:$0xff] }
  0x39   :  { %368 = vmatpush3.bf16.msra.mxu0 %v417_v1  ;;  %v64_v6 = vld [vmem:[#allocation2 + $0x8] sm:$0xff]  ;;  %v425_v9 = vld [vmem:[#allocation7] sm:$0xff]   ;;  %v65_v10 = vld [vmem:[#allocation2 + $0x10] sm:$0xff]  ;;  %403 = vmatprep.mubr.msk.bf16.mxu1 %vm539_vm0, %v538_v0 }
  0x3a   :  { %369 = vmatprep.subr.bf16.mxu0 %v418_v2  ;;  %v66_v7 = vpack.c.bf16 %v64_v6, %v63_v5  ;;  %v310_v8 = vmin.f32 %v63_v5, %v64_v6  ;;  %v421_v11 = vld [vmem:[#allocation5 + $0x20] sm:$0xff]   ;;  %388 = vmatpush3.bf16.msra.mxu1 %v425_v9  ;;  %v426_v13 = vld [vmem:[#allocation7 + $0x8] sm:$0xff]   ;;  %v427_v15 = vld [vmem:[#allocation7 + $0x10] sm:$0xff]   ;;  %v67_v19 = vpack.c.bf16 %v65_v10, %v65_v10 }
  0x3b   :  { %389 = vmatprep.subr.bf16.mxu1 %v538_v0  ;;  %v422_v14 = vld [vmem:[#allocation5 + $0x28] sm:$0xff]   ;;  %v423_v16 = vld [vmem:[#allocation5 + $0x30] sm:$0xff]   ;;  %v428_v17 = vld [vmem:[#allocation7 + $0x18] sm:$0xff]  }
  0x3c   :  { %383 = vmatprep.mubr.bf16.mxu0 %v66_v7  ;;  %v613_v12 = vmin.f32 %v310_v8, %v65_v10  ;;  %v424_v18 = vld [vmem:[#allocation5 + $0x38] sm:$0xff]   ;;  %v429_v20 = vld [vmem:[#allocation7 + $0x20] sm:$0xff]   ;;  %v430_v21 = vld [vmem:[#allocation7 + $0x28] sm:$0xff]  }
  0x3d   :  { %370 = vmatpush3.bf16.msra.mxu0 %v418_v2  ;;  %v431_v22 = vld [vmem:[#allocation7 + $0x30] sm:$0xff]   ;;  %v432_v23 = vld [vmem:[#allocation7 + $0x38] sm:$0xff]   ;;  %v330_v24 = vld [vmem:[%s636_s2] ss:$0 sm:$0xff]  ;;  %s540_s2 = smov [#allocation8]  }
  0x3e   :  { %371 = vmatprep.subr.bf16.mxu0 %v419_v3  ;;  %390 = vmatpush3.bf16.msra.mxu1 %v426_v13  ;;  %v339_v39 = vld [vmem:[%s638_s4] ss:$0 sm:$0xff]  ;;  %s320_s9 = sshll.u32 %s540_s2, 4  ;;  %s321_s9 = int_to_ptr.vmem [resolvable:$true] %s320_s9 }
  0x3f   :  { %391 = vmatprep.subr.bf16.mxu1 %v538_v0  ;;  %s503_s10 = scalar_lea.vmem %s321_s9, 128  ;;  %p508_p11 = scmp.lt.s32.totalorder %s321_s9, %s321_s9 }
  0x40   :  { %p504_p10 = scmp.ne.s32.totalorder %s321_s9, %s503_s10  ;;  %p509_p12 = scmp.lt.s32.totalorder %s503_s10, %s503_s10 }
  0x41   :  { %372 = vmatpush3.bf16.msra.mxu0 %v419_v3 }
  0x42   :  { %373 = vmatprep.subr.bf16.mxu0 %v420_v4  ;;  %392 = vmatpush3.bf16.msra.mxu1 %v427_v15  ;;  %p510_p13 = por %p509_p12, %p508_p11 }
  0x43   :  { %393 = vmatprep.subr.bf16.mxu1 %v538_v0 }
  0x44   :  { %p511_p0 = pnand %p510_p13, %p504_p10 }
  0x45   :  { %374 = vmatpush3.bf16.msra.mxu0 %v420_v4 }
  0x46   :  { %375 = vmatprep.subr.bf16.mxu0 %v421_v11  ;;  %394 = vmatpush3.bf16.msra.mxu1 %v428_v17 }
  0x47   :  { %395 = vmatprep.subr.bf16.mxu1 %v538_v0 }
  0x49   :  { %376 = vmatpush3.bf16.msra.mxu0 %v421_v11 }
  0x4a   :  { %377 = vmatprep.subr.bf16.mxu0 %v422_v14  ;;  %396 = vmatpush3.bf16.msra.mxu1 %v429_v20 }
  0x4b   :  { %397 = vmatprep.subr.bf16.mxu1 %v538_v0 }
  0x4d   :  { %378 = vmatpush3.bf16.msra.mxu0 %v422_v14 }
  0x4e   :  { %379 = vmatprep.subr.bf16.mxu0 %v423_v16  ;;  %398 = vmatpush3.bf16.msra.mxu1 %v430_v21 }
  0x4f   :  { %399 = vmatprep.subr.bf16.mxu1 %v538_v0 }
  0x51   :  { %380 = vmatpush3.bf16.msra.mxu0 %v423_v16 }
  0x52   :  { %381 = vmatprep.subr.bf16.mxu0 %v424_v18  ;;  %400 = vmatpush3.bf16.msra.mxu1 %v431_v22 }
  0x53   :  { %401 = vmatprep.subr.bf16.mxu1 %v538_v0 }
  0x55   :  { %382 = vmatpush3.bf16.msra.mxu0 %v424_v18 }
  0x56   :  { %402 = vmatpush3.bf16.msra.mxu1 %v432_v23 }
  0x58   :  { %384 = vmatmul.mubr.bf16.vlgmr.msra.gmra.mrb[0].mxu0 %v67_v19 }
 0x12b   :  { %v385_v25 = vpop.f32.mrb[0].mxu0 }
 0x12c   :  { %v173_v26 = vpop.f32.mrb[1].mxu0  ;;  %v182_v30 = vadd.f32 %v385_v25, %v330_v24 }
 0x12d   :  { %v174_v27 = vadd.f32 %v330_v24, %v173_v26  ;;  %v386_v28 = vpop.f32.mrb[2].mxu0 }
 0x12e   :  { %v176_v29 = vpop.f32.mrb[3].mxu0  ;;  %v189_v34 = vmax.f32 %v182_v30, 0.0 }
 0x12f   :  { %v177_v31 = vadd.f32 %v330_v24, %v176_v29  ;;  %v187_v32 = vmax.f32 %v174_v27, 0.0 }
 0x131   :  { %v188_v33 = vmax.f32 %v177_v31, 0.0 }
 0x133   :  { %v190_v35 = vadd.f32 %v188_v33, %v187_v32 }
 0x135   :  { %v191_v36 = vadd.f32 %v190_v35, %v189_v34 }
 0x137   :  { %v192_v37 = vmul.f32 0.33333334, %v191_v36 }
 0x139   :  { %v193_v38 = vpack.c.bf16 %v192_v37, %v192_v37 }
 0x13b   :  { %404 = vmatmul.mubr.bf16.vlgmr.msra.gmra.mrb[0].mxu1 %v193_v38 }
 0x20e   :  { %v299_v40 = vpop.f32.mrb[0].mxu1 }
 0x20f   :  { %v300_v41 = vadd.f32 %v339_v39, %v299_v40  ;;  %v405_v42 = vpop.f32.mrb[1].mxu1 }
 0x210   :  { %v302_v43 = vpop.f32.mrb[2].mxu1 }
 0x211   :  { %v305_v44 = vsub.f32 0.0, %v300_v41  ;;  %v406_v45 = vpop.f32.mrb[3].mxu1 }
 0x213   :  { %v306_v46 = vmul.f32 1.442695, %v305_v44 }
 0x215   :  { %433 = vpow2.f32 %v306_v46 }
 0x21f   :  { %v434_v47 = vpop.eup %433 }
 0x220   :  { %v308_v48 = vadd.f32 1.0, %v434_v47 }
 0x222   :  { %435 = vrcp.f32 %v308_v48 }
 0x22c   :  { %v436_v49 = vpop.eup %435 }
 0x22d   :  { %v312_v50 = vmul.f32 %v436_v49, %v613_v12 }
 0x22f   :  { %313 = vst [vmem:[#allocation8] sm:$0xff] %v312_v50 }
 0x230   :  { %514 = shalt.err (!%p511_p0)
}
 0x231   :  { %s515_s12 = scalar_lea.hbm %s639_s5, 128 }
 0x232   :  { %p516_p1 = scmp.ne.s32.totalorder %s639_s5, %s515_s12  ;;  %p519_p2 = scmp.lt.u32.totalorder %s515_s12, %s639_s5 }
 0x234   :  { %p521_p3 = pnand %p519_p2, %p516_p1 }
 0x236   :  { %524 = shalt.err (!%p521_p3)
}
 0x237   :  { %323 = dma.vmem_to_hbm [thread:$0]  %s321_s9, 128, %s639_s5, [#allocation4]  }
 0x238   :  { %529 = dma.done.wait [#allocation4], 128  }
 0x239   :  { %530 = vsyncadd [#allocation4], 4294967168 }
 0x23a   :  { %327 = vsyncpa [#allocation3], 1 }
 0x23b   :  { %328 = vsyncpa [#allocation6], 1 }
 0x23c   :  { %329 = vsyncpa [#allocation4], 1 }

</bundles_post_ra>
